<compile_context>
chip_gen: v7x
topology: tpu7x:2x2x1
jax: 0.10.0
libtpu: 0.0.40
codegen_flags: <defaults>
</compile_context>

<pallas_src>
import functools

import jax
import jax.numpy as jnp
import numpy as np
from jax.experimental import pallas as pl
from jax.experimental.pallas import tpu as pltpu


def _ce_loss_kernel(logits_ref, target_ref, loss_ref, *, ignore_label):
    """Per-pixel softmax cross entropy (classes on sublanes, pixels on lanes).

    logits_ref: (C, TP)  input dtype (f32 or bf16), upcast in-kernel
    target_ref: (1, TP)  int32
    loss_ref:   (1, TP)  float32 (0.0 for ignored pixels, as in torch CE 'none')
    """
    logits = logits_ref[...].astype(jnp.float32)            # (C, TP)
    tgt = target_ref[...]                                    # (1, TP) int32

    valid = tgt != ignore_label                              # (1, TP) bool
    tgt_c = jnp.where(valid, tgt, 0)                         # clamp ignore -> class 0

    # numerically stable log-softmax pieces (reduction over the class/sublane axis)
    m = jnp.max(logits, axis=0, keepdims=True)               # (1, TP)
    z = logits - m                                           # (C, TP)
    lse = jnp.log(jnp.sum(jnp.exp(z), axis=0, keepdims=True))  # (1, TP)

    # gather z at the target class via one-hot select (no dynamic gather on TPU)
    class_ids = jax.lax.broadcasted_iota(jnp.int32, logits.shape, 0)  # (C, TP)
    onehot = class_ids == tgt_c                               # (C, TP)
    z_true = jnp.sum(jnp.where(onehot, z, 0.0), axis=0, keepdims=True)  # (1, TP)

    loss = lse - z_true                                       # -log_softmax[target]
    loss_ref[...] = jnp.where(valid, loss, 0.0)


def _per_pixel_ce_loss(logits, tgt, ignore_label, tile_pixels):
    """logits: (N, C, HW), tgt: (N, 1, HW) int32  ->  loss (N, 1, HW) f32."""
    N, C, HW = logits.shape

    if HW <= tile_pixels:
        tile_p = HW                     # full dim -> any width is legal
    else:
        tile_p = tile_pixels            # multiple of 128; last block may be partial
        assert tile_p % 128 == 0
    num_tiles = pl.cdiv(HW, tile_p)

    kernel = functools.partial(_ce_loss_kernel, ignore_label=ignore_label)
    return pl.pallas_call(
        kernel,
        out_shape=jax.ShapeDtypeStruct((N, 1, HW), jnp.float32),
        grid=(N, num_tiles),
        in_specs=[
            # batch dim squeezed (None); classes on sublanes, pixels on lanes
            pl.BlockSpec((None, C, tile_p), lambda n, p: (n, 0, p)),
            pl.BlockSpec((None, 1, tile_p), lambda n, p: (n, 0, p)),
        ],
        out_specs=pl.BlockSpec((None, 1, tile_p), lambda n, p: (n, 0, p)),
        compiler_params=pltpu.CompilerParams(
            dimension_semantics=("parallel", "parallel"),
            vmem_limit_bytes=32 * 1024 * 1024,
        ),
    )(logits, tgt)


def ohem_cross_entropy(score, target, *, ignore_label=-1, thresh=0.7,
                       min_kept=100000, tile_pixels=32768):
    """OhemCrossEntropy.forward with NUM_OUTPUTS=1, BALANCE_WEIGHTS=(1.0,).

    score:  (N, C, H, W) logits (f32 or bf16), NCHW as in PyTorch
    target: (N, H, W)    int labels, `ignore_label` marks ignored pixels
    """
    min_kept = max(1, int(min_kept))
    N, C, H, W = score.shape
    assert target.shape == (N, H, W)
    HW = H * W
    P = N * HW

    # Free reshapes only (no transpose, no pad, no dtype cast in HBM).
    logits = score.reshape(N, C, HW)
    tgt = target.reshape(N, 1, HW).astype(jnp.int32)

    # Pallas kernel: per-pixel CE loss (0 for ignored pixels).
    loss = _per_pixel_ce_loss(logits, tgt, ignore_label, tile_pixels).reshape(P)

    # prob of the (clamped) target class and validity mask are recomputed cheaply.
    tgt_flat = target.reshape(P).astype(jnp.int32)
    valid = tgt_flat != ignore_label
    prob = jnp.exp(-loss)                 # == softmax prob of target for valid pixels

    # --- OHEM selection glue (order statistic + masked mean) in plain JAX ---
    num_valid = jnp.sum(valid.astype(jnp.int32))
    masked_prob = jnp.where(valid, prob, jnp.inf)

    # k-th smallest valid prob via top_k of the min_kept+1 smallest values
    # (avoids a full sort of all N*H*W pixels).
    k_static = int(min(min_kept + 1, P))
    neg_topk, _ = jax.lax.top_k(-masked_prob, k_static)
    smallest = -neg_topk                                  # ascending smallest probs
    k_idx = jnp.clip(jnp.minimum(jnp.int32(min_kept), num_valid - 1),
                     0, k_static - 1)
    min_value = smallest[k_idx]
    threshold = jnp.maximum(min_value, jnp.float32(thresh))

    sel = valid & (prob < threshold)      # strict <, matching PyTorch
    total = jnp.sum(jnp.where(sel, loss, 0.0))
    cnt = jnp.sum(sel.astype(jnp.float32))
    # guard the num_valid == 0 / empty-selection path (would otherwise be NaN)
    return jnp.where(cnt > 0, total / cnt, jnp.float32(0.0))


def _reference(score, target, ignore_label, thresh, min_kept):
    """Pure-JAX reference mirroring the PyTorch semantics (full sort)."""
    N, C, H, W = score.shape
    logits = jnp.transpose(score, (0, 2, 3, 1)).reshape(-1, C).astype(jnp.float32)
    tgt = target.reshape(-1).astype(jnp.int32)
    valid = tgt != ignore_label
    tgt_c = jnp.where(valid, tgt, 0)
    logp = jax.nn.log_softmax(logits, axis=-1)
    lp_true = jnp.take_along_axis(logp, tgt_c[:, None], axis=-1)[:, 0]
    loss = jnp.where(valid, -lp_true, 0.0)
    prob = jnp.exp(lp_true)
    num_valid = jnp.sum(valid)
    sorted_prob = jnp.sort(jnp.where(valid, prob, jnp.inf))
    k = jnp.minimum(jnp.int32(min_kept), num_valid.astype(jnp.int32) - 1)
    threshold = jnp.maximum(sorted_prob[k], jnp.float32(thresh))
    sel = valid & (prob < threshold)
    return jnp.sum(jnp.where(sel, loss, 0.0)) / jnp.sum(sel).astype(jnp.float32)


if __name__ == "__main__":
    key = jax.random.PRNGKey(0)
    k_score, k_tgt, k_ign = jax.random.split(key, 3)

    N, C, H, W = 2, 8, 16, 16
    ignore_label = -1
    thresh = 0.7
    min_kept = 100

    score = jax.random.normal(k_score, (N, C, H, W), dtype=jnp.float32) * 2.0
    target = jax.random.randint(k_tgt, (N, H, W), 0, C, dtype=jnp.int32)
    # sprinkle some ignored pixels
    ign_mask = jax.random.uniform(k_ign, (N, H, W)) < 0.1
    target = jnp.where(ign_mask, ignore_label, target)

    fn = jax.jit(functools.partial(
        ohem_cross_entropy, ignore_label=ignore_label, thresh=thresh,
        min_kept=min_kept))
    out = jax.block_until_ready(fn(score, target))

    ref = jax.block_until_ready(
        _reference(score, target, ignore_label, thresh, min_kept))

    np.testing.assert_allclose(np.asarray(out), np.asarray(ref),
                               rtol=1e-3, atol=1e-5)
    print("KERNEL_OK")
</pallas_src>

<mosaic_0001>
module attributes {stable_mosaic.version = 11 : i64} {
  func.func @_ce_loss_kernel(%arg0: i32, %arg1: i32, %arg2: memref<1x8x256xf32, #tpu.memory_space<vmem>>, %arg3: memref<1x1x256xi32, #tpu.memory_space<vmem>>, %arg4: memref<1x1x256xf32, #tpu.memory_space<vmem>>) attributes {dimension_semantics = [#tpu.dimension_semantics<parallel>, #tpu.dimension_semantics<parallel>], iteration_bounds = array<i64: 2, 1>, scalar_prefetch = 0 : i64, scratch_operands = 0 : i64, tpu.core_type = #tpu.core_type<tc>, window_params = [{transform_indices = @transform_0, window_bounds = array<i64: 1, 8, 256>}, {transform_indices = @transform_1, window_bounds = array<i64: 1, 1, 256>}, {transform_indices = @transform_2, window_bounds = array<i64: 1, 1, 256>}]} {
    %c0 = arith.constant 0 : index
    %c0_0 = arith.constant 0 : index
    %c0_1 = arith.constant 0 : index
    %0 = vector.load %arg2[%c0, %c0_0, %c0_1] : memref<1x8x256xf32, #tpu.memory_space<vmem>>, vector<1x8x256xf32>
    %1 = vector.shape_cast %0 : vector<1x8x256xf32> to vector<8x256xf32>
    %c0_2 = arith.constant 0 : index
    %c0_3 = arith.constant 0 : index
    %c0_4 = arith.constant 0 : index
    %2 = vector.load %arg3[%c0_2, %c0_3, %c0_4] : memref<1x1x256xi32, #tpu.memory_space<vmem>>, vector<1x1x256xi32>
    %3 = vector.shape_cast %2 : vector<1x1x256xi32> to vector<1x256xi32>
    %c-1_i32 = arith.constant -1 : i32
    %4 = vector.broadcast %c-1_i32 : i32 to vector<1x256xi32>
    %5 = arith.cmpi ne, %3, %4 : vector<1x256xi32>
    %c0_i32 = arith.constant 0 : i32
    %6 = vector.broadcast %c0_i32 : i32 to vector<1x256xi32>
    %7 = arith.select %5, %3, %6 : vector<1x256xi1>, vector<1x256xi32>
    %cst = arith.constant dense<0xFF800000> : vector<256xf32>
    %8 = vector.multi_reduction <maximumf>, %1, %cst [0] : vector<8x256xf32> to vector<256xf32>
    %9 = vector.shape_cast %8 : vector<256xf32> to vector<1x256xf32>
    %10 = vector.broadcast %9 : vector<1x256xf32> to vector<8x256xf32>
    %11 = arith.subf %1, %10 : vector<8x256xf32>
    %12 = math.exp %11 : vector<8x256xf32>
    %cst_5 = arith.constant dense<0.000000e+00> : vector<256xf32>
    %13 = vector.multi_reduction <add>, %12, %cst_5 [0] : vector<8x256xf32> to vector<256xf32>
    %14 = vector.shape_cast %13 : vector<256xf32> to vector<1x256xf32>
    %15 = math.log %14 : vector<1x256xf32>
    %16 = tpu.iota {dimensions = array<i32: 0>} : vector<8x256xi32>
    %17 = vector.broadcast %7 : vector<1x256xi32> to vector<8x256xi32>
    %18 = arith.cmpi eq, %16, %17 : vector<8x256xi32>
    %cst_6 = arith.constant 0.000000e+00 : f32
    %19 = vector.broadcast %cst_6 : f32 to vector<8x256xf32>
    %20 = arith.select %18, %11, %19 : vector<8x256xi1>, vector<8x256xf32>
    %cst_7 = arith.constant dense<0.000000e+00> : vector<256xf32>
    %21 = vector.multi_reduction <add>, %20, %cst_7 [0] : vector<8x256xf32> to vector<256xf32>
    %22 = vector.shape_cast %21 : vector<256xf32> to vector<1x256xf32>
    %23 = arith.subf %15, %22 : vector<1x256xf32>
    %cst_8 = arith.constant 0.000000e+00 : f32
    %24 = vector.broadcast %cst_8 : f32 to vector<1x256xf32>
    %25 = arith.select %5, %23, %24 : vector<1x256xi1>, vector<1x256xf32>
    %c0_9 = arith.constant 0 : index
    %c0_10 = arith.constant 0 : index
    %c0_11 = arith.constant 0 : index
    %26 = vector.load %arg4[%c0_9, %c0_10, %c0_11] : memref<1x1x256xf32, #tpu.memory_space<vmem>>, vector<1x1x256xf32>
    %27 = vector.shape_cast %26 : vector<1x1x256xf32> to vector<1x256xf32>
    %28 = vector.shape_cast %25 : vector<1x256xf32> to vector<1x1x256xf32>
    tpu.vector_store %arg4[%c0_9, %c0_10, %c0_11], %28 {strides = array<i32>} : memref<1x1x256xf32, #tpu.memory_space<vmem>>, vector<1x1x256xf32>,
    return
  }
  func.func @transform_0(%arg0: i32, %arg1: i32) -> (i32, i32, i32) {
    %c0_i32 = arith.constant 0 : i32
    %c0_i32_0 = arith.constant 0 : i32
    return %arg0, %c0_i32, %arg1 : i32, i32, i32
  }
  func.func @transform_1(%arg0: i32, %arg1: i32) -> (i32, i32, i32) {
    %c0_i32 = arith.constant 0 : i32
    %c0_i32_0 = arith.constant 0 : i32
    return %arg0, %c0_i32, %arg1 : i32, i32, i32
  }
  func.func @transform_2(%arg0: i32, %arg1: i32) -> (i32, i32, i32) {
    %c0_i32 = arith.constant 0 : i32
    %c0_i32_0 = arith.constant 0 : i32
    return %arg0, %c0_i32, %arg1 : i32, i32, i32
  }
}

</mosaic_0001>

<bundles_post_ra>
// kernel: ohem_cross_entropy.1
= control target key start
LH: loop header
LB: loop body
LE: loop exit
PB: predicated region body
PF: predicated region fallthrough
CT: control target
= control target key end

     0   :  { %s486_s9 = smov 0   ;;  %s488_s10 = smov 0   ;;  %s540_s0 = inlined_call_operand.vmem [shape: f32[2,8,256], index: 0, kind: input, shape index: {}]   ;;  %s541_s1 = inlined_call_operand.vmem [shape: s32[2,1,256], index: 1, kind: input, shape index: {}]   ;;  %s542_s2 = inlined_call_operand.vmem [shape: f32[2,1,256], index: 2, kind: output, shape index: {}]  }
   0x1   :  { %s490_s11 = smov 0  }
   0x2 LB: > { %s24_s12 = sadd.s32 1, %s464_s10  ;;  %p405_p0 = scmp.ge.s32.totalorder %s468_s11, 1  ;;  %s468_s11 = sphi %s490_s11, %s12_s11   ;;  %s464_s10 = sphi %s488_s10, %s544_s10   ;;  %s460_s9 = sphi %s486_s9, %s543_s9  }
   0x3   : > { %p26_p1 = scmp.ge.s32.totalorder %s24_s12, 2  ;;  %p149_p2 = scmp.lt.s32.totalorder %s468_s11, 3 }
   0x5   : > { %s546_s12 = smov (%p26_p1, %s24_s12), 0  ;;  %p150_p3 = pnand %p405_p0, %p149_p2 }
   0x6   : > { %p187_p4 = scmp.lt.s32.totalorder (!%p150_p3), %s460_s9, 1  ;;  %v253_v10 = vlaneseq (!%p150_p3)  ;;  %v470_v52 = vmov (!%p150_p3), 1966171168  }
   0x7   : > { %153 = sbr.rel (%p150_p3) target bundleno = 81 (0x51), region = 28  ;;  %v285_v53 = vunpack.c.l.s4 (!%p150_p3), %v470_v52 }
   0x8   : > { %v254_v16 = vshrl.u32 (!%p150_p3), %v253_v10, 7  ;;  %vm302_vm3 = vcmp.lt.s32.totalorder (!%p150_p3), %v253_v10, 256 }
   0x9   : > { %v286_v57 = vunpack.c.0.s8 (!%p150_p3), %v285_v53 }
   0xa   : > { %v257_v21 = vsub.s32 (!%p150_p3), 0, %v254_v16  ;;  %v261_v23 = vsub.s32 (!%p150_p3), 1, %v254_v16 }
   0xb   : > { %v289_v63 = vsub.s32 (!%p150_p3), %v286_v57, %v254_v16 }
   0xe   : > { %s548_s9 = smov (!%p187_p4, %s460_s9), 1 }
   0xf   : > { %s412_s13 = sshll.u32 %s548_s9, 4  ;;  %s408_s17 = sshll.u32 %s548_s9, 1 }
  0x10   : > { %s194_s16 = scalar_lea.vmem %s540_s0, %s412_s13  ;;  %s203_s20 = scalar_lea.vmem %s541_s1, %s408_s17 }
  0x11   : > { %v214_v0 = vld [vmem:[%s194_s16] sm:$0xff]  ;;  %v215_v1 = vld [vmem:[%s194_s16 + $0x8] sm:$0xff]  ;;  %s212_s23 = scalar_lea.vmem %s542_s2, %s408_s17 }
  0x12   : > { %v219_v2 = vrot.slane %v214_v0, 4  ;;  %v225_v3 = vrot.slane %v215_v1, 4  ;;  %v516_v13 = vld [vmem:[%s203_s20] sm:$0x3] }
  0x13   : > { %vm217_vm0 = vcmp.ne.s32.totalorder %v516_v13, 4294967295 }
  0x14   : > { %v220_v4 = vmax.f32 %v214_v0, %v219_v2  ;;  %v226_v5 = vmax.f32 %v215_v1, %v225_v3  ;;  %v218_v22 = vsel %vm217_vm0, %v516_v13, 0 }
  0x15   : > { %v258_v24 = vrot.slane %v218_v22, %v257_v21  ;;  %v262_v25 = vrot.slane %v218_v22, %v261_v23 }
  0x16   : > { %v221_v6 = vrot.slane %v220_v4, 2  ;;  %v227_v7 = vrot.slane %v226_v5, 2 }
  0x17   : > { %vm263_vm1 = vcmp.eq.s32.totalorder %v254_v16, %v258_v24  ;;  %vm264_vm2 = vcmp.eq.s32.totalorder %v254_v16, %v262_v25 }
  0x18   : > { %v222_v8 = vmax.f32 %v220_v4, %v221_v6  ;;  %v228_v9 = vmax.f32 %v226_v5, %v227_v7 }
  0x1a   : > { %v223_v11 = vrot.slane %v222_v8, 1  ;;  %v229_v12 = vrot.slane %v228_v9, 1 }
  0x1c   : > { %v224_v14 = vmax.f32 %v222_v8, %v223_v11  ;;  %v230_v15 = vmax.f32 %v228_v9, %v229_v12 }
  0x1e   : > { %v231_v17 = vsub.f32 %v214_v0, %v224_v14  ;;  %v232_v18 = vsub.f32 %v215_v1, %v230_v15 }
  0x20   : > { %v233_v19 = vmul.f32 1.442695, %v231_v17  ;;  %v235_v20 = vmul.f32 1.442695, %v232_v18  ;;  %v265_v26 = vsel %vm263_vm1, %v231_v17, 0.0  ;;  %v266_v28 = vsel %vm264_vm2, %v232_v18, 0.0 }
  0x21   : > { %v267_v32 = vrot.slane %v265_v26, 4  ;;  %v273_v34 = vrot.slane %v266_v28, 4 }
  0x22   : > { %438 = vpow2.f32 %v233_v19 }
  0x23   : > { %440 = vpow2.f32 %v235_v20  ;;  %v268_v38 = vadd.f32 %v267_v32, %v265_v26  ;;  %v274_v40 = vadd.f32 %v273_v34, %v266_v28 }
  0x25   : > { %v269_v44 = vrot.slane %v268_v38, 2  ;;  %v275_v46 = vrot.slane %v274_v40, 2 }
  0x27   : > { %v270_v48 = vadd.f32 %v269_v44, %v268_v38  ;;  %v276_v49 = vadd.f32 %v275_v46, %v274_v40 }
  0x29   : > { %v271_v50 = vrot.slane %v270_v48, 1  ;;  %v277_v51 = vrot.slane %v276_v49, 1 }
  0x2b   : > { %v272_v54 = vadd.f32 %v271_v50, %v270_v48  ;;  %v278_v56 = vadd.f32 %v277_v51, %v276_v49 }
  0x2c   : > { %v439_v27 = vpop.eup %438 }
  0x2d   : > { %v441_v29 = vpop.eup %440  ;;  %v237_v30 = vrot.slane %v439_v27, 4 }
  0x2e   : > { %v243_v31 = vrot.slane %v441_v29, 4 }
  0x2f   : > { %v238_v33 = vadd.f32 %v439_v27, %v237_v30 }
  0x30   : > { %v244_v35 = vadd.f32 %v441_v29, %v243_v31 }
  0x31   : > { %v239_v36 = vrot.slane %v238_v33, 2 }
  0x32   : > { %v245_v37 = vrot.slane %v244_v35, 2 }
  0x33   : > { %v240_v39 = vadd.f32 %v239_v36, %v238_v33 }
  0x34   : > { %v246_v41 = vadd.f32 %v245_v37, %v244_v35 }
  0x35   : > { %v241_v42 = vrot.slane %v240_v39, 1 }
  0x36   : > { %v247_v43 = vrot.slane %v246_v41, 1 }
  0x37   : > { %v242_v45 = vadd.f32 %v241_v42, %v240_v39 }
  0x38   : > { %v248_v47 = vadd.f32 %v247_v43, %v246_v41 }
  0x39   : > { %442 = vlog2.f32 %v242_v45 }
  0x3a   : > { %444 = vlog2.f32 %v248_v47 }
  0x43   : > { %v443_v55 = vpop.eup %442 }
  0x44   : > { %v445_v58 = vpop.eup %444  ;;  %v250_v59 = vmul.f32 0.6931472, %v443_v55 }
  0x45   : > { %v252_v60 = vmul.f32 0.6931472, %v445_v58 }
  0x46   : > { %v279_v61 = vsub.f32 %v250_v59, %v272_v54 }
  0x47   : > { %v280_v62 = vsub.f32 %v252_v60, %v278_v56 }
  0x49   : > { %v283_v0 = vcombine.low %v279_v61, %v280_v62 }
  0x4b   : > { %v290_v1 = vrot.slane %v283_v0, %v289_v63 }
  0x4d   : > { %v297_v2 = vrot.slane %v290_v1, %v289_v63 }
  0x4f   : > { %v299_v3 = vsel %vm217_vm0, %v297_v2, 0.0 }
  0x50   : > { %304 = vst.msk [vmem:[%s212_s23] sm:$0x3] %vm302_vm3, %v299_v3 }
  0x51 PF: > { %s12_s11 = sadd.s32 1, %s468_s11   ;;  %s543_s9 = smov %s464_s10 }
  0x52   : > { %p9_p5 = scmp.ge.s32.totalorder %s12_s11, 4   ;;  %s544_s10 = smov %s546_s12 }
  0x54   :  { %11 = sbr.rel (!%p9_p5) target bundleno = 2 (0x2), region = 61 }

</bundles_post_ra>
